<compile_context>
chip_gen: v7x
topology: tpu7x:2x2x1
jax: 0.10.0
libtpu: 0.0.40
codegen_flags: <defaults>
</compile_context>

<pallas_src>
import functools

import jax
import jax.numpy as jnp
from jax.experimental import pallas as pl
from jax.experimental.pallas import tpu as pltpu


def _topk_softargmax_kernel(hm_ref, out_ref, *, topk, width, stride, row_chunk):
    """hm_ref: [block_c, H*W] (native dtype) -> out_ref: [block_c, 2] float32."""
    block_c, hw = hm_ref.shape
    num_chunks = block_c // row_chunk

    # Hoisted outside both the chunk loop and the k loop; (1, HW) to minimize vregs.
    col_ids = jax.lax.broadcasted_iota(jnp.int32, (1, hw), 1)

    w_is_pow2 = (width & (width - 1)) == 0
    w_shift = max(width.bit_length() - 1, 0)

    def process_chunk(r0):
        # Cast to f32 immediately on load.
        x = hm_ref[pl.ds(r0, row_chunk), :].astype(jnp.float32)

        sum_w = jnp.zeros((row_chunk, 1), jnp.float32)
        sum_wx = jnp.zeros((row_chunk, 1), jnp.float32)
        sum_wy = jnp.zeros((row_chunk, 1), jnp.float32)
        m_top = None

        # topk is small and static -> unrolled iterative masked argmax.
        for k in range(topk):
            m_k = jnp.max(x, axis=-1, keepdims=True)            # [rc, 1]  (XLU reduce)
            if k == 0:
                m_top = m_k                                      # softmax max == top-1 score
                w_k = jnp.ones_like(m_k)                         # exp(0) == 1, skip the exp
            else:
                w_k = jnp.exp(m_k - m_top)                       # EUP

            is_max = x == m_k                                    # [rc, HW]  (VPU)
            # First (smallest) index among ties -> matches top_k / torch.topk ordering.
            idx_k = jnp.min(jnp.where(is_max, col_ids, hw), axis=-1, keepdims=True)

            if w_is_pow2:
                xs = (idx_k & (width - 1)).astype(jnp.float32)   # x = col
                ys = (idx_k >> w_shift).astype(jnp.float32)      # y = row
            else:
                xs = (idx_k % width).astype(jnp.float32)
                ys = (idx_k // width).astype(jnp.float32)

            sum_w = sum_w + w_k
            sum_wx = sum_wx + w_k * xs
            sum_wy = sum_wy + w_k * ys

            if k + 1 < topk:
                # Knock out the selected max (reuse is_max; float heatmaps don't tie).
                x = jnp.where(is_max, -jnp.inf, x)

        inv = pl.reciprocal(sum_w) * jnp.float32(stride)          # one recip, two muls
        coord = jnp.concatenate([sum_wx * inv, sum_wy * inv], axis=-1)  # [rc, 2]
        out_ref[pl.ds(r0, row_chunk), :] = coord.astype(out_ref.dtype)

    if num_chunks == 1:
        process_chunk(0)
    else:
        def body(c, carry):
            process_chunk(pl.multiple_of(c * row_chunk, row_chunk))
            return carry
        jax.lax.fori_loop(0, num_chunks, body, 0)


def _pick_block_c(C, hw, itemsize):
    """Channels per grid step: as many as fit a v7x-safe double-buffered VMEM budget."""
    budget_rows = max(8, (8 * 1024 * 1024) // (2 * hw * itemsize))   # ~8 MiB x2 buffers
    if C <= budget_rows:
        return C
    best = None
    for d in range(8, budget_rows + 1, 8):   # must be a multiple of 8 if < C
        if C % d == 0:
            best = d
    return best if best is not None else C


def _pick_row_chunk(block_c, hw):
    """In-kernel row chunk: keep the live f32 tile around <=32 vregs."""
    max_rows = max(8, (32 * 1024) // max(hw, 1))
    rc = max(1, min(block_c, 32, max_rows))
    while block_c % rc:
        rc -= 1
    return rc


def binary_heatmap2coordinate(x, *, topk=5, stride=4.0, block_c=None):
    """x: [N, 2, C, H, W] float32/bfloat16; returns [N, C, 2] float32."""
    N, two, C, H, W = x.shape
    assert two == 2, "expected binary heatmap axis of size 2"
    HW = H * W

    # Free, contiguous reshape: the fg-channel selection happens in the BlockSpec below.
    xr = x.reshape(N, 2, C, HW)

    if block_c is None:
        block_c = _pick_block_c(C, HW, xr.dtype.itemsize)
    assert C % block_c == 0 and (block_c == C or block_c % 8 == 0), (
        "block_c must divide C and be a multiple of 8 (or equal C)")
    row_chunk = _pick_row_chunk(block_c, HW)

    kernel = functools.partial(
        _topk_softargmax_kernel,
        topk=int(topk), width=int(W), stride=float(stride), row_chunk=row_chunk,
    )

    grid = (N, C // block_c)
    out = pl.pallas_call(
        kernel,
        out_shape=jax.ShapeDtypeStruct((N, C, 2), jnp.float32),
        grid_spec=pltpu.PrefetchScalarGridSpec(
            num_scalar_prefetch=0,
            grid=grid,
            in_specs=[
                # Squeeze batch and the binary axis; index 1 on the binary axis selects fg,
                # so only foreground rows are ever DMA'd from HBM.
                pl.BlockSpec((None, None, block_c, HW), lambda n, c: (n, 1, c, 0)),
            ],
            out_specs=pl.BlockSpec((None, block_c, 2), lambda n, c: (n, c, 0)),
        ),
        compiler_params=pltpu.CompilerParams(
            dimension_semantics=("parallel", "parallel"),
            vmem_limit_bytes=32 * 1024 * 1024,
        ),
    )(xr)
    return out


def _reference(x, *, topk=5, stride=4.0):
    """Pure-JAX reference mirroring the PyTorch forward."""
    hm = x[:, 1].astype(jnp.float32)
    N, C, H, W = hm.shape
    flat = hm.reshape(N, C, H * W)
    score, index = jax.lax.top_k(flat, topk)                 # [N, C, k]
    xs = (index % W).astype(jnp.float32)
    ys = (index // W).astype(jnp.float32)
    w = jax.nn.softmax(score, axis=-1)
    return stride * jnp.stack([(xs * w).sum(-1), (ys * w).sum(-1)], axis=-1)


if __name__ == "__main__":
    key = jax.random.PRNGKey(0)
    # N=2, binary axis=2, C=4 landmark channels, H=W=16
    x = jax.random.normal(key, (2, 2, 4, 16, 16), dtype=jnp.float32)

    out = binary_heatmap2coordinate(x, topk=5, stride=4.0)
    out = jax.block_until_ready(out)

    ref = _reference(x, topk=5, stride=4.0)
    assert out.shape == (2, 4, 2) and out.dtype == jnp.float32
    assert jnp.allclose(out, ref, atol=1e-4, rtol=1e-4), (out, ref)

    print("KERNEL_OK")
</pallas_src>

<mosaic_0001>
module attributes {stable_mosaic.version = 11 : i64} {
  func.func @_topk_softargmax_kernel(%arg0: i32, %arg1: i32, %arg2: memref<1x1x4x256xf32, #tpu.memory_space<vmem>>, %arg3: memref<1x4x2xf32, #tpu.memory_space<vmem>>) attributes {dimension_semantics = [#tpu.dimension_semantics<parallel>, #tpu.dimension_semantics<parallel>], iteration_bounds = array<i64: 2, 1>, scalar_prefetch = 0 : i64, scratch_operands = 0 : i64, tpu.core_type = #tpu.core_type<tc>, window_params = [{transform_indices = @transform_0, window_bounds = array<i64: 1, 1, 4, 256>}, {transform_indices = @transform_1, window_bounds = array<i64: 1, 4, 2>}]} {
    %0 = tpu.iota {dimensions = array<i32: 1>} : vector<1x256xi32>
    %c0 = arith.constant 0 : index
    %c0_0 = arith.constant 0 : index
    %c0_1 = arith.constant 0 : index
    %c0_2 = arith.constant 0 : index
    %1 = vector.load %arg2[%c0, %c0_0, %c0_1, %c0_2] : memref<1x1x4x256xf32, #tpu.memory_space<vmem>>, vector<1x1x4x256xf32>
    %2 = vector.shape_cast %1 : vector<1x1x4x256xf32> to vector<4x256xf32>
    %cst = arith.constant 0.000000e+00 : f32
    %3 = vector.broadcast %cst : f32 to vector<4x1xf32>
    %cst_3 = arith.constant 0.000000e+00 : f32
    %4 = vector.broadcast %cst_3 : f32 to vector<4x1xf32>
    %cst_4 = arith.constant 0.000000e+00 : f32
    %5 = vector.broadcast %cst_4 : f32 to vector<4x1xf32>
    %cst_5 = arith.constant dense<0xFF800000> : vector<4xf32>
    %6 = vector.multi_reduction <maximumf>, %2, %cst_5 [1] : vector<4x256xf32> to vector<4xf32>
    %7 = vector.shape_cast %6 : vector<4xf32> to vector<4x1xf32>
    %cst_6 = arith.constant 1.000000e+00 : f32
    %8 = vector.broadcast %cst_6 : f32 to vector<4x1xf32>
    %9 = vector.broadcast %7 : vector<4x1xf32> to vector<4x256xf32>
    %10 = arith.cmpf oeq, %2, %9 : vector<4x256xf32>
    %c256_i32 = arith.constant 256 : i32
    %11 = vector.shape_cast %0 : vector<1x256xi32> to vector<1x256xi32>
    %12 = vector.broadcast %11 : vector<1x256xi32> to vector<4x256xi32>
    %13 = vector.broadcast %c256_i32 : i32 to vector<4x256xi32>
    %14 = arith.select %10, %12, %13 : vector<4x256xi1>, vector<4x256xi32>
    %cst_7 = arith.constant dense<2147483647> : vector<4xi32>
    %15 = vector.multi_reduction <minsi>, %14, %cst_7 [1] : vector<4x256xi32> to vector<4xi32>
    %16 = vector.shape_cast %15 : vector<4xi32> to vector<4x1xi32>
    %c15_i32 = arith.constant 15 : i32
    %17 = vector.broadcast %c15_i32 : i32 to vector<4x1xi32>
    %18 = arith.andi %16, %17 : vector<4x1xi32>
    %19 = arith.sitofp %18 : vector<4x1xi32> to vector<4x1xf32>
    %c4_i32 = arith.constant 4 : i32
    %20 = vector.broadcast %c4_i32 : i32 to vector<4x1xi32>
    %21 = arith.shrsi %16, %20 : vector<4x1xi32>
    %22 = arith.sitofp %21 : vector<4x1xi32> to vector<4x1xf32>
    %23 = arith.addf %3, %8 : vector<4x1xf32>
    %24 = arith.mulf %8, %19 : vector<4x1xf32>
    %25 = arith.addf %4, %24 : vector<4x1xf32>
    %26 = arith.mulf %8, %22 : vector<4x1xf32>
    %27 = arith.addf %5, %26 : vector<4x1xf32>
    %cst_8 = arith.constant 0xFF800000 : f32
    %28 = vector.broadcast %cst_8 : f32 to vector<4x256xf32>
    %29 = arith.select %10, %28, %2 : vector<4x256xi1>, vector<4x256xf32>
    %cst_9 = arith.constant dense<0xFF800000> : vector<4xf32>
    %30 = vector.multi_reduction <maximumf>, %29, %cst_9 [1] : vector<4x256xf32> to vector<4xf32>
    %31 = vector.shape_cast %30 : vector<4xf32> to vector<4x1xf32>
    %32 = arith.subf %31, %7 : vector<4x1xf32>
    %33 = math.exp %32 : vector<4x1xf32>
    %34 = vector.broadcast %31 : vector<4x1xf32> to vector<4x256xf32>
    %35 = arith.cmpf oeq, %29, %34 : vector<4x256xf32>
    %c256_i32_10 = arith.constant 256 : i32
    %36 = vector.shape_cast %0 : vector<1x256xi32> to vector<1x256xi32>
    %37 = vector.broadcast %36 : vector<1x256xi32> to vector<4x256xi32>
    %38 = vector.broadcast %c256_i32_10 : i32 to vector<4x256xi32>
    %39 = arith.select %35, %37, %38 : vector<4x256xi1>, vector<4x256xi32>
    %cst_11 = arith.constant dense<2147483647> : vector<4xi32>
    %40 = vector.multi_reduction <minsi>, %39, %cst_11 [1] : vector<4x256xi32> to vector<4xi32>
    %41 = vector.shape_cast %40 : vector<4xi32> to vector<4x1xi32>
    %c15_i32_12 = arith.constant 15 : i32
    %42 = vector.broadcast %c15_i32_12 : i32 to vector<4x1xi32>
    %43 = arith.andi %41, %42 : vector<4x1xi32>
    %44 = arith.sitofp %43 : vector<4x1xi32> to vector<4x1xf32>
    %c4_i32_13 = arith.constant 4 : i32
    %45 = vector.broadcast %c4_i32_13 : i32 to vector<4x1xi32>
    %46 = arith.shrsi %41, %45 : vector<4x1xi32>
    %47 = arith.sitofp %46 : vector<4x1xi32> to vector<4x1xf32>
    %48 = arith.addf %23, %33 : vector<4x1xf32>
    %49 = arith.mulf %33, %44 : vector<4x1xf32>
    %50 = arith.addf %25, %49 : vector<4x1xf32>
    %51 = arith.mulf %33, %47 : vector<4x1xf32>
    %52 = arith.addf %27, %51 : vector<4x1xf32>
    %cst_14 = arith.constant 0xFF800000 : f32
    %53 = vector.broadcast %cst_14 : f32 to vector<4x256xf32>
    %54 = arith.select %35, %53, %29 : vector<4x256xi1>, vector<4x256xf32>
    %cst_15 = arith.constant dense<0xFF800000> : vector<4xf32>
    %55 = vector.multi_reduction <maximumf>, %54, %cst_15 [1] : vector<4x256xf32> to vector<4xf32>
    %56 = vector.shape_cast %55 : vector<4xf32> to vector<4x1xf32>
    %57 = arith.subf %56, %7 : vector<4x1xf32>
    %58 = math.exp %57 : vector<4x1xf32>
    %59 = vector.broadcast %56 : vector<4x1xf32> to vector<4x256xf32>
    %60 = arith.cmpf oeq, %54, %59 : vector<4x256xf32>
    %c256_i32_16 = arith.constant 256 : i32
    %61 = vector.shape_cast %0 : vector<1x256xi32> to vector<1x256xi32>
    %62 = vector.broadcast %61 : vector<1x256xi32> to vector<4x256xi32>
    %63 = vector.broadcast %c256_i32_16 : i32 to vector<4x256xi32>
    %64 = arith.select %60, %62, %63 : vector<4x256xi1>, vector<4x256xi32>
    %cst_17 = arith.constant dense<2147483647> : vector<4xi32>
    %65 = vector.multi_reduction <minsi>, %64, %cst_17 [1] : vector<4x256xi32> to vector<4xi32>
    %66 = vector.shape_cast %65 : vector<4xi32> to vector<4x1xi32>
    %c15_i32_18 = arith.constant 15 : i32
    %67 = vector.broadcast %c15_i32_18 : i32 to vector<4x1xi32>
    %68 = arith.andi %66, %67 : vector<4x1xi32>
    %69 = arith.sitofp %68 : vector<4x1xi32> to vector<4x1xf32>
    %c4_i32_19 = arith.constant 4 : i32
    %70 = vector.broadcast %c4_i32_19 : i32 to vector<4x1xi32>
    %71 = arith.shrsi %66, %70 : vector<4x1xi32>
    %72 = arith.sitofp %71 : vector<4x1xi32> to vector<4x1xf32>
    %73 = arith.addf %48, %58 : vector<4x1xf32>
    %74 = arith.mulf %58, %69 : vector<4x1xf32>
    %75 = arith.addf %50, %74 : vector<4x1xf32>
    %76 = arith.mulf %58, %72 : vector<4x1xf32>
    %77 = arith.addf %52, %76 : vector<4x1xf32>
    %cst_20 = arith.constant 0xFF800000 : f32
    %78 = vector.broadcast %cst_20 : f32 to vector<4x256xf32>
    %79 = arith.select %60, %78, %54 : vector<4x256xi1>, vector<4x256xf32>
    %cst_21 = arith.constant dense<0xFF800000> : vector<4xf32>
    %80 = vector.multi_reduction <maximumf>, %79, %cst_21 [1] : vector<4x256xf32> to vector<4xf32>
    %81 = vector.shape_cast %80 : vector<4xf32> to vector<4x1xf32>
    %82 = arith.subf %81, %7 : vector<4x1xf32>
    %83 = math.exp %82 : vector<4x1xf32>
    %84 = vector.broadcast %81 : vector<4x1xf32> to vector<4x256xf32>
    %85 = arith.cmpf oeq, %79, %84 : vector<4x256xf32>
    %c256_i32_22 = arith.constant 256 : i32
    %86 = vector.shape_cast %0 : vector<1x256xi32> to vector<1x256xi32>
    %87 = vector.broadcast %86 : vector<1x256xi32> to vector<4x256xi32>
    %88 = vector.broadcast %c256_i32_22 : i32 to vector<4x256xi32>
    %89 = arith.select %85, %87, %88 : vector<4x256xi1>, vector<4x256xi32>
    %cst_23 = arith.constant dense<2147483647> : vector<4xi32>
    %90 = vector.multi_reduction <minsi>, %89, %cst_23 [1] : vector<4x256xi32> to vector<4xi32>
    %91 = vector.shape_cast %90 : vector<4xi32> to vector<4x1xi32>
    %c15_i32_24 = arith.constant 15 : i32
    %92 = vector.broadcast %c15_i32_24 : i32 to vector<4x1xi32>
    %93 = arith.andi %91, %92 : vector<4x1xi32>
    %94 = arith.sitofp %93 : vector<4x1xi32> to vector<4x1xf32>
    %c4_i32_25 = arith.constant 4 : i32
    %95 = vector.broadcast %c4_i32_25 : i32 to vector<4x1xi32>
    %96 = arith.shrsi %91, %95 : vector<4x1xi32>
    %97 = arith.sitofp %96 : vector<4x1xi32> to vector<4x1xf32>
    %98 = arith.addf %73, %83 : vector<4x1xf32>
    %99 = arith.mulf %83, %94 : vector<4x1xf32>
    %100 = arith.addf %75, %99 : vector<4x1xf32>
    %101 = arith.mulf %83, %97 : vector<4x1xf32>
    %102 = arith.addf %77, %101 : vector<4x1xf32>
    %cst_26 = arith.constant 0xFF800000 : f32
    %103 = vector.broadcast %cst_26 : f32 to vector<4x256xf32>
    %104 = arith.select %85, %103, %79 : vector<4x256xi1>, vector<4x256xf32>
    %cst_27 = arith.constant dense<0xFF800000> : vector<4xf32>
    %105 = vector.multi_reduction <maximumf>, %104, %cst_27 [1] : vector<4x256xf32> to vector<4xf32>
    %106 = vector.shape_cast %105 : vector<4xf32> to vector<4x1xf32>
    %107 = arith.subf %106, %7 : vector<4x1xf32>
    %108 = math.exp %107 : vector<4x1xf32>
    %109 = vector.broadcast %106 : vector<4x1xf32> to vector<4x256xf32>
    %110 = arith.cmpf oeq, %104, %109 : vector<4x256xf32>
    %c256_i32_28 = arith.constant 256 : i32
    %111 = vector.shape_cast %0 : vector<1x256xi32> to vector<1x256xi32>
    %112 = vector.broadcast %111 : vector<1x256xi32> to vector<4x256xi32>
    %113 = vector.broadcast %c256_i32_28 : i32 to vector<4x256xi32>
    %114 = arith.select %110, %112, %113 : vector<4x256xi1>, vector<4x256xi32>
    %cst_29 = arith.constant dense<2147483647> : vector<4xi32>
    %115 = vector.multi_reduction <minsi>, %114, %cst_29 [1] : vector<4x256xi32> to vector<4xi32>
    %116 = vector.shape_cast %115 : vector<4xi32> to vector<4x1xi32>
    %c15_i32_30 = arith.constant 15 : i32
    %117 = vector.broadcast %c15_i32_30 : i32 to vector<4x1xi32>
    %118 = arith.andi %116, %117 : vector<4x1xi32>
    %119 = arith.sitofp %118 : vector<4x1xi32> to vector<4x1xf32>
    %c4_i32_31 = arith.constant 4 : i32
    %120 = vector.broadcast %c4_i32_31 : i32 to vector<4x1xi32>
    %121 = arith.shrsi %116, %120 : vector<4x1xi32>
    %122 = arith.sitofp %121 : vector<4x1xi32> to vector<4x1xf32>
    %123 = arith.addf %98, %108 : vector<4x1xf32>
    %124 = arith.mulf %108, %119 : vector<4x1xf32>
    %125 = arith.addf %100, %124 : vector<4x1xf32>
    %126 = arith.mulf %108, %122 : vector<4x1xf32>
    %127 = arith.addf %102, %126 : vector<4x1xf32>
    %128 = tpu.reciprocal %123 : vector<4x1xf32> -> vector<4x1xf32>
    %cst_32 = arith.constant 4.000000e+00 : f32
    %129 = vector.broadcast %cst_32 : f32 to vector<4x1xf32>
    %130 = arith.mulf %128, %129 : vector<4x1xf32>
    %131 = arith.mulf %125, %130 : vector<4x1xf32>
    %132 = arith.mulf %127, %130 : vector<4x1xf32>
    %133 = tpu.concatenate %131, %132 in 1 : vector<4x1xf32>, vector<4x1xf32> -> vector<4x2xf32>
    %c0_33 = arith.constant 0 : index
    %c0_34 = arith.constant 0 : index
    %c0_35 = arith.constant 0 : index
    %134 = vector.load %arg3[%c0_33, %c0_34, %c0_35] : memref<1x4x2xf32, #tpu.memory_space<vmem>>, vector<1x4x2xf32>
    %135 = vector.shape_cast %134 : vector<1x4x2xf32> to vector<4x2xf32>
    %136 = vector.shape_cast %133 : vector<4x2xf32> to vector<1x4x2xf32>
    tpu.vector_store %arg3[%c0_33, %c0_34, %c0_35], %136 {strides = array<i32>} : memref<1x4x2xf32, #tpu.memory_space<vmem>>, vector<1x4x2xf32>,
    return
  }
  func.func @transform_0(%arg0: i32, %arg1: i32) -> (i32, i32, i32, i32) {
    %c1_i32 = arith.constant 1 : i32
    %c0_i32 = arith.constant 0 : i32
    %c0_i32_0 = arith.constant 0 : i32
    return %arg0, %c1_i32, %arg1, %c0_i32 : i32, i32, i32, i32
  }
  func.func @transform_1(%arg0: i32, %arg1: i32) -> (i32, i32, i32) {
    %c0_i32 = arith.constant 0 : i32
    %c0_i32_0 = arith.constant 0 : i32
    return %arg0, %arg1, %c0_i32 : i32, i32, i32
  }
}

</mosaic_0001>

<bundles_post_ra>
// kernel: tpu_custom_call.1
= control target key start
LH: loop header
LB: loop body
LE: loop exit
PB: predicated region body
PF: predicated region fallthrough
CT: control target
= control target key end

     0   :  { %6 = vsyncpa [#allocation3], 0  ;;  %s882_s0 = inlined_call_operand.hbm [shape: f32[2,2,4,256], index: 0, kind: input, shape index: {}]   ;;  %s883_s1 = inlined_call_operand.vmem [shape: f32[2,4,2], index: 1, kind: output, shape index: {}]  }
   0x1   :  { %8 = vsyncpa [#allocation3 + $0x1], 0  ;;  %s682_s6 = smov 0   ;;  %s684_s7 = smov 0  }
   0x2   :  { %s686_s8 = smov 0   ;;  %s688_s9 = smov 0  }
   0x3   :  { %s690_s10 = smov 0   ;;  %s692_s11 = smov 0  }
   0x4 LB: > { %s507_s12 = sadd.s32 4294967295, %s668_s11   ;;  %s26_s13 = sadd.s32 1, %s664_s10  ;;  %s668_s11 = sphi %s692_s11, %s14_s11   ;;  %s664_s10 = sphi %s690_s10, %s895_s10   ;;  %s660_s9 = sphi %s688_s9, %s894_s9   ;;  %s656_s8 = sphi %s686_s8, %s893_s8   ;;  %s652_s7 = sphi %s684_s7, %s892_s7   ;;  %s648_s6 = sphi %s682_s6, %s891_s6  }
   0x5   : > { %p28_p0 = scmp.ge.s32.totalorder %s26_s13, 2  ;;  %s35_s14 = sadd.s32 1, %s656_s8 }
   0x6   : > { %p42_p1 = scmp.ne.s32.totalorder %s656_s8, %s652_s7  ;;  %p43_p2 = scmp.eq.s32.totalorder %s668_s11, 0 }
   0x7   : > { %s897_s13 = smov (%p28_p0, %s26_s13), 0  ;;  %p48_p4 = scmp.ne.s32.totalorder %s652_s7, %s648_s6 }
   0x8   : > { %p718_p3 = por %p43_p2, %p42_p1  ;;  %s30_s16 = ssub.s32 %s664_s10, %s897_s13 }
   0x9   : > { %p49_p5 = scmp.eq.s32.totalorder %s507_s12, 0  ;;  %p33_p6 = scmp.eq.s32.totalorder %s30_s16, 0 }
   0xa   : > { %p526_p8 = scmp.lt.s32.totalorder %s668_s11, 2  ;;  %s100_s19 = sand.u32 1, %s656_s8  }
   0xb   : > { %p725_p7 = por %p49_p5, %p48_p4  ;;  %s519_s20 = sshll.u32 %s664_s10, 8 }
   0xc   : > { %s731_s18 = scalar_select %p33_p6, %s656_s8, %s35_s14  }
   0xd   : > { %s511_s21 = sshll.u32 %s100_s19, 3  ;;  %s455_s24 = scalar_lea.hbm %s882_s0, %s519_s20 }
   0xe   : > { %s738_s25 = scalar_lea.hbm %s455_s24, 128  ;;  %s104_s26 = scalar_lea.vmem [#allocation2], %s511_s21 }
   0xf   : > { %s115_s27 = sshll.u32 %s104_s26, 4  ;;  %p744_p9 = pnand %p526_p8, %p718_p3  ;;  %s740_s27 = int_to_ptr.vmem [resolvable:$true] %s115_s27 }
  0x10   : > { %s101_s29 = scalar_lea.sflag [#allocation3], %s100_s19  ;;  %s617_s30 = scalar_lea.hbm %s455_s24, 256 }
  0x11   : > { %p588_p12 = scmp.ne.s32.totalorder %s738_s25, %s617_s30  ;;  %p589_p13 = pneg %p744_p9 }
  0x12   : > { %s592_s4 = scalar_lea.hbm %s882_s0, 512  ;;  %p593_p2 = scmp.lt.u32.totalorder %s738_s25, %s882_s0 }
  0x13   : > { %p590_p0 = pnand %p589_p13, %p588_p12  ;;  %p594_p3 = scmp.lt.u32.totalorder %s592_s4, %s617_s30 }
  0x14   : > { %p596_p5 = scmp.lt.u32.totalorder %s617_s30, %s738_s25 }
  0x15   : > { %p591_p1 = pneg %p590_p0  ;;  %p595_p4 = por %p594_p3, %p593_p2 }
  0x17   : > { %p597_p6 = por %p596_p5, %p595_p4 }
  0x19   : > { %p598_p8 = pnand %p597_p6, %p591_p1 }
  0x1b   : > { %601 = shalt.err (!%p598_p8)
}
  0x1c   : > { %s602_s12 = scalar_lea.vmem %s740_s27, 128  ;;  %s670_s14 = smov [#allocation2]  }
  0x1d   : > { %p603_p12 = scmp.ne.s32.totalorder %s740_s27, %s602_s12  ;;  %s607_s15 = sshll.u32 %s670_s14, 4  ;;  %s608_s15 = int_to_ptr.vmem [resolvable:$false] %s607_s15 }
  0x1e   : > { %s609_s16 = scalar_lea.vmem %s608_s15, 256  ;;  %p610_p11 = scmp.lt.s32.totalorder %s740_s27, %s608_s15 }
  0x1f   : > { %p605_p0 = pnand %p603_p12, %p589_p13  ;;  %p611_p2 = scmp.lt.s32.totalorder %s609_s16, %s602_s12 }
  0x21   : > { %p606_p10 = pneg %p605_p0  ;;  %p612_p3 = por %p611_p2, %p610_p11 }
  0x23   : > { %p613_p4 = pnand %p612_p3, %p606_p10 }
  0x25   : > { %616 = shalt.err (!%p613_p4)
}
  0x26   : > { %525 = dma.hbm_to_vmem [thread:$0]  (!%p744_p9), %s738_s25, 128, %s740_s27, %s101_s29  }
  0x27   : > { %p887_p1 = scmp.lt.s32.totalorder %s668_s11, 3  ;;  %p888_p5 = scmp.ge.s32.totalorder %s668_s11, 1 }
  0x29   : > { %p121_p13 = pnand %p888_p5, %p887_p1 }
  0x2a   : > { %s126_s19 = sand.u32 (!%p121_p13), 1, %s652_s7  }
  0x2b   : > { %124 = sbr.rel (%p121_p13) target bundleno = 1118 (0x45e), region = 24  ;;  %s515_s20 = sshll.u32 (!%p121_p13), %s126_s19, 3 }
  0x2c   : > { %s127_s21 = scalar_lea.sflag (!%p121_p13), [#allocation3], %s126_s19  ;;  %s130_s22 = scalar_lea.vmem (!%p121_p13), [#allocation2], %s515_s20 }
  0x32   : > { %643 = dma.done.wait (%p725_p7), %s127_s21, 128  }
  0x33   : > { %645 = vsyncadd (%p725_p7), %s127_s21, 4294967168  ;;  %vm165_vm0 = vcmask 1043456   ;;  %v161_v0 = vld [vmem:[%s130_s22] sm:$0xff]  ;;  %v158_v5 = vlaneseq  ;;  %v671_v6 = vmov 839922192   ;;  %p151_p7 = scmp.lt.s32.totalorder %s660_s9, 1 }
  0x34   : > { %v163_v1 = vcombine.high %v161_v0, %v161_v0  ;;  %v166_v2 = vsel %vm165_vm0, %v161_v0, -inf  ;;  %v173_v7 = vunpack.c.l.s4 %v671_v6 }
  0x35   : > { %v176_v9 = vshrl.u32 %v158_v5, 7  ;;  %v159_v26 = vand.u32 127, %v158_v5  ;;  %s899_s9 = smov (!%p151_p7, %s660_s9), 1 }
  0x36   : > { %v167_v3 = vsel %vm165_vm0, %v163_v1, -inf  ;;  %v174_v8 = vunpack.c.0.s8 %v173_v7  ;;  %s516_s17 = sshll.u32 %s899_s9, 2 }
  0x37   : > { %v168_v4 = vmax.f32 %v166_v2, %v167_v3  ;;  %v160_v27 = vadd.s32 128, %v159_v26  ;;  %s157_s25 = scalar_lea.vmem %s883_s1, %s516_s17 }
  0x38   : > { %v785_v10 = vsub.s32 %v174_v8, %v176_v9 }
  0x39   : > { %169 = vmax.xlane.f32.xlu0 %v168_v4  ;;  %v805_v28 = vcombine.low %v159_v26, %v160_v27 }
  0xc6   : > { %v787_v11 = vpop.xlane.xlu0 %169 }
  0xc7   : > { %v178_v12 = vrot.slane %v787_v11, %v785_v10 }
  0xc9   : > { %vm791_vm1 = vcmp.eq.f32.partialorder %v161_v0, %v178_v12 }
  0xca   : > { %v208_v14 = vsel %vm791_vm1, -inf, %v161_v0  ;;  %v182_v50 = vsel %vm791_vm1, %v805_v28, 256  ;;  %vm418_vm1 = vcmask 11264  }
  0xcb   : > { %v210_v15 = vcombine.high %v208_v14, %v208_v14  ;;  %v212_v16 = vsel %vm165_vm0, %v208_v14, -inf  ;;  %v183_v51 = vcombine.high %v182_v50, %v182_v50  ;;  %v184_v55 = vsel %vm165_vm0, %v182_v50, 2147483647 }
  0xcd   : > { %v213_v17 = vsel %vm165_vm0, %v210_v15, -inf  ;;  %v185_v52 = vsel %vm165_vm0, %v183_v51, 2147483647 }
  0xce   : > { %v214_v18 = vmax.f32 %v212_v16, %v213_v17  ;;  %vm186_vm6 = vcmp.lt.s32.totalorder %v184_v55, %v185_v52 }
  0xcf   : > { %v187_v60 = vsel %vm186_vm6, %v184_v55, %v185_v52 }
  0xd0   : > { %215 = vmax.xlane.f32.xlu0 %v214_v18  ;;  %v189_v2 = vshra.s32 %v187_v60, 16 }
  0xd2   : > { %v191_v4 = vcvt.s32.f32 %v189_v2 }
 0x15d   : > { %v799_v19 = vpop.xlane.xlu0 %215 }
 0x15e   : > { %v227_v20 = vrot.slane %v799_v19, %v785_v10  ;;  %v217_v17 = vsub.f32 %v799_v19, %v787_v11 }
 0x160   : > { %vm229_vm2 = vcmp.eq.f32.partialorder %v208_v14, %v227_v20  ;;  %v218_v20 = vmul.f32 1.442695, %v217_v17 }
 0x161   : > { %v259_v21 = vsel %vm229_vm2, -inf, %v208_v14  ;;  %v230_v29 = vsel %vm229_vm2, %v805_v28, 256 }
 0x162   : > { %v261_v22 = vcombine.high %v259_v21, %v259_v21  ;;  %v263_v23 = vsel %vm165_vm0, %v259_v21, -inf  ;;  %v231_v30 = vcombine.high %v230_v29, %v230_v29  ;;  %v232_v34 = vsel %vm165_vm0, %v230_v29, 2147483647 }
 0x163   : > { %577 = vpow2.f32 %v218_v20 }
 0x164   : > { %v264_v24 = vsel %vm165_vm0, %v261_v22, -inf  ;;  %v233_v31 = vsel %vm165_vm0, %v231_v30, 2147483647 }
 0x165   : > { %v265_v25 = vmax.f32 %v263_v23, %v264_v24  ;;  %vm234_vm3 = vcmp.lt.s32.totalorder %v232_v34, %v233_v31 }
 0x166   : > { %v235_v39 = vsel %vm234_vm3, %v232_v34, %v233_v31 }
 0x167   : > { %266 = vmax.xlane.f32.xlu1 %v265_v25  ;;  %v237_v45 = vshra.s32 %v235_v39, 16  ;;  %v236_v7 = vand.u32 65535, %v235_v39 }
 0x169   : > { %v239_v47 = vcvt.s32.f32 %v237_v45  ;;  %v238_v12 = vcvt.s32.f32 %v236_v7 }
 0x16d   : > { %v578_v30 = vpop.eup %577 }
 0x1f4   : > { %v809_v32 = vpop.xlane.xlu1 %266 }
 0x1f5   : > { %v278_v33 = vrot.slane %v809_v32, %v785_v10  ;;  %v268_v18 = vsub.f32 %v809_v32, %v787_v11 }
 0x1f7   : > { %vm280_vm4 = vcmp.eq.f32.partialorder %v259_v21, %v278_v33  ;;  %v269_v22 = vmul.f32 1.442695, %v268_v18 }
 0x1f8   : > { %v281_v35 = vsel %vm280_vm4, %v805_v28, 256  ;;  %v310_v36 = vsel %vm280_vm4, -inf, %v259_v21 }
 0x1f9   : > { %v282_v37 = vcombine.high %v281_v35, %v281_v35  ;;  %v312_v38 = vcombine.high %v310_v36, %v310_v36  ;;  %v314_v40 = vsel %vm165_vm0, %v310_v36, -inf  ;;  %v283_v42 = vsel %vm165_vm0, %v281_v35, 2147483647 }
 0x1fa   : > { %579 = vpow2.f32 %v269_v22 }
 0x1fb   : > { %v315_v41 = vsel %vm165_vm0, %v312_v38, -inf  ;;  %v284_v43 = vsel %vm165_vm0, %v282_v37, 2147483647 }
 0x1fc   : > { %v316_v44 = vmax.f32 %v314_v40, %v315_v41  ;;  %vm285_vm5 = vcmp.lt.s32.totalorder %v283_v42, %v284_v43 }
 0x1fd   : > { %v286_v46 = vsel %vm285_vm5, %v283_v42, %v284_v43 }
 0x1fe   : > { %317 = vmax.xlane.f32.xlu1 %v316_v44  ;;  %v288_v48 = vshra.s32 %v286_v46, 16  ;;  %v287_v13 = vand.u32 65535, %v286_v46 }
 0x200   : > { %v290_v49 = vcvt.s32.f32 %v288_v48  ;;  %v289_v15 = vcvt.s32.f32 %v287_v13 }
 0x202   : > { %240 = vmin.xlane.f32.xlu1 %v239_v47 }
 0x204   : > { %v843_v33 = vpop.eup %579 }
 0x206   : > { %291 = vmin.xlane.f32.xlu1 %v290_v49 }
 0x28b   : > { %v318_v53 = vpop.xlane.xlu1 %317 }
 0x28c   : > { %v329_v54 = vrot.slane %v318_v53, %v785_v10  ;;  %v319_v21 = vsub.f32 %v318_v53, %v787_v11 }
 0x28e   : > { %vm331_vm7 = vcmp.eq.f32.partialorder %v310_v36, %v329_v54  ;;  %v320_v23 = vmul.f32 1.442695, %v319_v21 }
 0x28f   : > { %v332_v56 = vsel %vm331_vm7, %v805_v28, 256  ;;  %v361_v57 = vsel %vm331_vm7, -inf, %v310_v36  ;;  %v830_v6 = vpop.xlane.xlu1 %240 }
 0x290   : > { %v333_v58 = vcombine.high %v332_v56, %v332_v56  ;;  %v363_v59 = vcombine.high %v361_v57, %v361_v57  ;;  %v365_v61 = vsel %vm165_vm0, %v361_v57, -inf  ;;  %v334_v63 = vsel %vm165_vm0, %v332_v56, 2147483647 }
 0x291   : > { %vm242_vm9 = vcmp.eq.f32.partialorder %v239_v47, %v830_v6  ;;  %581 = vpow2.f32 %v320_v23 }
 0x292   : > { %v366_v62 = vsel %vm165_vm0, %v363_v59, -inf  ;;  %v335_v0 = vsel %vm165_vm0, %v333_v58, 2147483647  ;;  %v243_v14 = vsel %vm242_vm9, %v238_v12, inf }
 0x293   : > { %v367_v1 = vmax.f32 %v365_v61, %v366_v62  ;;  %vm336_vm8 = vcmp.lt.s32.totalorder %v334_v63, %v335_v0  ;;  %v292_v9 = vpop.xlane.xlu1 %291 }
 0x294   : > { %v337_v3 = vsel %vm336_vm8, %v334_v63, %v335_v0  ;;  %vm293_vm10 = vcmp.eq.f32.partialorder %v290_v49, %v292_v9  ;;  %v247_v49 = vcvt.f32.s32 %v830_v6  ;;  %v298_v53 = vcvt.f32.s32 %v292_v9 }
 0x295   : > { %368 = vmax.xlane.f32.xlu0 %v367_v1  ;;  %v339_v5 = vshra.s32 %v337_v3, 16  ;;  %v294_v16 = vsel %vm293_vm10, %v289_v15, inf  ;;  %v338_v43 = vand.u32 65535, %v337_v3 }
 0x296   : > { %v248_v52 = vshll.u32 %v247_v49, 16 }
 0x297   : > { %v341_v8 = vcvt.s32.f32 %v339_v5  ;;  %v340_v46 = vcvt.s32.f32 %v338_v43 }
 0x299   : > { %192 = vmin.xlane.f32.xlu0 %v191_v4 }
 0x29b   : > { %v845_v37 = vpop.eup %581 }
 0x29d   : > { %342 = vmin.xlane.f32.xlu0 %v341_v8 }
 0x2a1   : > { %244 = vmin.xlane.f32.xlu0 %v243_v14 }
 0x2a5   : > { %295 = vmin.xlane.f32.xlu0 %v294_v16 }
 0x322   : > { %v369_v24 = vpop.xlane.xlu0 %368 }
 0x323   : > { %v370_v25 = vsub.f32 %v369_v24, %v787_v11  ;;  %v380_v26 = vrot.slane %v369_v24, %v785_v10  ;;  %v254_v11 = vadd.f32 1.0, %v578_v30  ;;  %v188_v10 = vand.u32 65535, %v187_v60 }
 0x325   : > { %v371_v27 = vmul.f32 1.442695, %v370_v25  ;;  %vm382_vm11 = vcmp.eq.f32.partialorder %v361_v57, %v380_v26  ;;  %v190_v42 = vcvt.s32.f32 %v188_v10  ;;  %v299_v57 = vshll.u32 %v298_v53, 16 }
 0x326   : > { %v383_v19 = vsel %vm382_vm11, %v805_v28, 256  ;;  %v193_v34 = vpop.xlane.xlu0 %192  ;;  %v305_v28 = vadd.f32 %v843_v33, %v254_v11 }
 0x327   : > { %583 = vpow2.f32 %v371_v27  ;;  %v384_v29 = vcombine.high %v383_v19, %v383_v19  ;;  %v385_v31 = vsel %vm165_vm0, %v383_v19, 2147483647  ;;  %vm194_vm13 = vcmp.eq.f32.partialorder %v191_v4, %v193_v34 }
 0x328   : > { %v356_v39 = vadd.f32 %v845_v37, %v305_v28  ;;  %v195_v45 = vsel %vm194_vm13, %v190_v42, inf  ;;  %v199_v60 = vcvt.f32.s32 %v193_v34 }
 0x329   : > { %v386_v32 = vsel %vm165_vm0, %v384_v29, 2147483647  ;;  %vm416_vm0 = vcmask 7168  }
 0x32a   : > { %vm387_vm12 = vcmp.lt.s32.totalorder %v385_v31, %v386_v32  ;;  %v343_v41 = vpop.xlane.xlu0 %342  ;;  %v200_v2 = vshll.u32 %v199_v60, 16 }
 0x32b   : > { %v388_v35 = vsel %vm387_vm12, %v385_v31, %v386_v32  ;;  %vm344_vm14 = vcmp.eq.f32.partialorder %v341_v8, %v343_v41  ;;  %v349_v3 = vcvt.f32.s32 %v343_v41 }
 0x32c   : > { %v390_v36 = vshra.s32 %v388_v35, 16  ;;  %v345_v47 = vsel %vm344_vm14, %v340_v46, inf  ;;  %v389_v54 = vand.u32 65535, %v388_v35 }
 0x32d   : > { %v350_v13 = vshll.u32 %v349_v3, 16 }
 0x32e   : > { %v392_v38 = vcvt.s32.f32 %v390_v36  ;;  %v245_v48 = vpop.xlane.xlu0 %244  ;;  %v391_v59 = vcvt.s32.f32 %v389_v54 }
 0x32f   : > { %v246_v50 = vcvt.f32.s32 %v245_v48 }
 0x330   : > { %393 = vmin.xlane.f32.xlu1 %v392_v38 }
 0x331   : > { %v849_v40 = vpop.eup %583  ;;  %v249_v55 = vadd.s32 %v248_v52, %v246_v50 }
 0x332   : > { %v407_v44 = vadd.f32 %v849_v40, %v356_v39  ;;  %v296_v51 = vpop.xlane.xlu0 %295 }
 0x333   : > { %v297_v56 = vcvt.f32.s32 %v296_v51  ;;  %v250_v61 = vand.u32 15, %v249_v55  ;;  %v252_v62 = vshra.s32 %v249_v55, 4 }
 0x334   : > { %196 = vmin.xlane.f32.xlu1 %v195_v45  ;;  %585 = vrcp.f32 %v407_v44 }
 0x335   : > { %v300_v63 = vadd.s32 %v299_v57, %v297_v56  ;;  %v251_v5 = vcvt.s32.f32 %v250_v61  ;;  %v253_v6 = vcvt.s32.f32 %v252_v62 }
 0x337   : > { %v301_v7 = vand.u32 15, %v300_v63  ;;  %v303_v8 = vshra.s32 %v300_v63, 4  ;;  %v255_v17 = vmul.f32 %v578_v30, %v251_v5  ;;  %v257_v18 = vmul.f32 %v578_v30, %v253_v6 }
 0x338   : > { %346 = vmin.xlane.f32.xlu1 %v345_v47 }
 0x339   : > { %v302_v20 = vcvt.s32.f32 %v301_v7  ;;  %v304_v21 = vcvt.s32.f32 %v303_v8 }
 0x33b   : > { %v306_v29 = vmul.f32 %v843_v33, %v302_v20  ;;  %v308_v31 = vmul.f32 %v843_v33, %v304_v21 }
 0x33e   : > { %v586_v48 = vpop.eup %585 }
 0x3bd   : > { %v394_v58 = vpop.xlane.xlu1 %393 }
 0x3be   : > { %vm395_vm15 = vcmp.eq.f32.partialorder %v392_v38, %v394_v58  ;;  %v400_v28 = vcvt.f32.s32 %v394_v58 }
 0x3bf   : > { %v396_v0 = vsel %vm395_vm15, %v391_v59, inf }
 0x3c0   : > { %397 = vmin.xlane.f32.xlu0 %v396_v0  ;;  %v401_v41 = vshll.u32 %v400_v28, 16 }
 0x3c1   : > { %v197_v1 = vpop.xlane.xlu1 %196 }
 0x3c2   : > { %v198_v4 = vcvt.f32.s32 %v197_v1 }
 0x3c4   : > { %v201_v9 = vadd.s32 %v200_v2, %v198_v4 }
 0x3c5   : > { %v347_v12 = vpop.xlane.xlu1 %346 }
 0x3c6   : > { %v202_v14 = vand.u32 15, %v201_v9  ;;  %v204_v15 = vshra.s32 %v201_v9, 4  ;;  %v348_v16 = vcvt.f32.s32 %v347_v12 }
 0x3c8   : > { %v203_v22 = vcvt.s32.f32 %v202_v14  ;;  %v205_v23 = vcvt.s32.f32 %v204_v15  ;;  %v351_v24 = vadd.s32 %v350_v13, %v348_v16 }
 0x3ca   : > { %v256_v25 = vadd.f32 %v255_v17, %v203_v22  ;;  %v258_v26 = vadd.f32 %v257_v18, %v205_v23  ;;  %v352_v27 = vand.u32 15, %v351_v24  ;;  %v354_v19 = vshra.s32 %v351_v24, 4 }
 0x3cc   : > { %v353_v32 = vcvt.s32.f32 %v352_v27  ;;  %v355_v34 = vcvt.s32.f32 %v354_v19  ;;  %v307_v35 = vadd.f32 %v306_v29, %v256_v25  ;;  %v309_v36 = vadd.f32 %v308_v31, %v258_v26 }
 0x3ce   : > { %v357_v30 = vmul.f32 %v845_v37, %v353_v32  ;;  %v359_v11 = vmul.f32 %v845_v37, %v355_v34  ;;  %v413_v37 = vmul.f32 4.0, %v586_v48 }
 0x3d0   : > { %v358_v10 = vadd.f32 %v357_v30, %v307_v35  ;;  %v360_v38 = vadd.f32 %v359_v11, %v309_v36 }
 0x44d   : > { %v398_v39 = vpop.xlane.xlu0 %397 }
 0x44e   : > { %v399_v42 = vcvt.f32.s32 %v398_v39 }
 0x450   : > { %v402_v43 = vadd.s32 %v401_v41, %v399_v42 }
 0x452   : > { %v403_v45 = vand.u32 15, %v402_v43  ;;  %v405_v33 = vshra.s32 %v402_v43, 4 }
 0x454   : > { %v404_v46 = vcvt.s32.f32 %v403_v45  ;;  %v406_v47 = vcvt.s32.f32 %v405_v33 }
 0x456   : > { %v408_v49 = vmul.f32 %v849_v40, %v404_v46  ;;  %v410_v50 = vmul.f32 %v849_v40, %v406_v47 }
 0x458   : > { %v409_v51 = vadd.f32 %v408_v49, %v358_v10  ;;  %v411_v52 = vadd.f32 %v410_v50, %v360_v38 }
 0x45a   : > { %v414_v44 = vmul.f32 %v413_v37, %v409_v51  ;;  %v415_v53 = vmul.f32 %v413_v37, %v411_v52 }
 0x45c   : > { %v417_v54 = vsel %vm416_vm0, %v414_v44, %v415_v53 }
 0x45d   : > { %419 = vst.msk [vmem:[%s157_s25] sm:$0xf] %vm418_vm1, %v417_v54 }
 0x45e PF: > { %s14_s11 = sadd.s32 1, %s668_s11   ;;  %s891_s6 = smov %s652_s7 }
 0x45f   : > { %p11_p9 = scmp.ge.s32.totalorder %s14_s11, 4   ;;  %s892_s7 = smov %s656_s8 }
 0x460   : > { %s893_s8 = smov %s731_s18  ;;  %s894_s9 = smov %s664_s10 }
 0x461   : > { %s895_s10 = smov %s897_s13  ;;  %13 = sbr.rel (!%p11_p9) target bundleno = 4 (0x4), region = 64 }
 0x468   :  { %445 = vsyncpa [#allocation3], 1 }
 0x469   :  { %447 = vsyncpa [#allocation3 + $0x1], 1 }

</bundles_post_ra>
